<compile_context>
chip_gen: v7x
topology: tpu7x:2x2x1
jax: 0.10.0
libtpu: 0.0.40
codegen_flags: <defaults>
</compile_context>

<pallas_src>
import functools
import math

import jax
import jax.numpy as jnp
from jax.experimental import pallas as pl
from jax.experimental.pallas import tpu as pltpu

LANE = 128
SUBLANE = 8


def _cdiv(a, b):
    return -(-a // b)


def _round_up(x, m):
    return _cdiv(x, m) * m


def _pad2d(x, rows, cols):
    r, c = x.shape
    return jnp.pad(x, ((0, rows - r), (0, cols - c)))


def mlp_policy_kernel(obs_ref, w1_ref, w2_ref, w3_ref, consts_ref, eps_ref,
                      out_ref, *, ac_dim):
    """One batch tile: MLP mean -> rsample -> diag-MVN log_prob, fused output.

    Output layout (single lane-dense unmasked store):
      out[:, :ac_dim]   = action
      out[:, ac_dim]    = log_prob      (spare zero-padded lane)
      out[:, ac_dim+1:] = 0
    """
    mm_dtype = w1_ref.dtype            # f32, or bf16 if the wrapper cast obs/weights
    h_p = w1_ref.shape[1]
    ac_p = w3_ref.shape[1]

    # Fused tiny pinned operands (b1, b2, b3, logstd packed as rows 0..3).
    c = consts_ref[...]
    b1 = c[0:1, :h_p]
    b2 = c[1:2, :h_p]
    b3 = c[2:3, :ac_p]
    logstd = c[3:4, :ac_p]

    # mean_net: Linear -> tanh -> Linear -> tanh -> Linear.  MXU consumes
    # mm_dtype operands; accumulation and all elementwise/transcendental work
    # stays f32 (v5e has no bf16 VPU/EUP).
    x = obs_ref[...]                                                  # (TB, OBSp)
    h1 = jnp.tanh(jnp.dot(x, w1_ref[...],
                          preferred_element_type=jnp.float32) + b1)
    h2 = jnp.tanh(jnp.dot(h1.astype(mm_dtype), w2_ref[...],
                          preferred_element_type=jnp.float32) + b2)
    mean = jnp.dot(h2.astype(mm_dtype), w3_ref[...],
                   preferred_element_type=jnp.float32) + b3           # (TB, ACp)

    # rsample(): action = mean + std * eps (std broadcasts over batch rows).
    # Padded lanes: mean = 0 (zero w3/b3 columns), eps = 0 -> action padding 0.
    std = jnp.exp(logstd)                                             # (1, ACp)
    eps = eps_ref[...]                                                # f32 (TB, ACp)
    action = mean + std * eps

    # MultivariateNormal(mean, scale_tril=diag(std)).log_prob(action):
    # z = (action - mean)/std == eps exactly, so log_prob is independent of the
    # matmul dtype; padded eps/logstd lanes are zero, so sums are exact.
    maha = jnp.sum(eps * eps, axis=-1, keepdims=True)                 # (TB, 1)
    log_det = jnp.sum(logstd, axis=-1, keepdims=True)                 # (1, 1)
    logp = -0.5 * maha - log_det - 0.5 * ac_dim * math.log(2.0 * math.pi)

    # Pack log_prob into spare padded lane `ac_dim`: one fused lane-dense
    # output stream instead of action + a separate (TB,128) logp slab.
    lane = jax.lax.broadcasted_iota(jnp.int32, action.shape, 1)
    out_ref[...] = jnp.where(lane == ac_dim, logp, action)


def _pick_batch_tile(B, stream_bytes_per_row, *, tb, stream_vmem_budget):
    """Batch-tile size TB and padded batch B_p.

    - B is padded only to a multiple of 8; TB is then re-derived so the grid
      blocks evenly and B_p/B stays ~1 (no round_up(B, TB) blow-up).
    - TB is capped so the grid has >=4 steps when B allows (v7x: 2 TCs each
      need >=2 steps for megacore sharding + double-buffered DMA).
    - TB is shrunk while the double-buffered streamed tiles exceed the budget.
    """
    B8 = _round_up(max(B, 1), SUBLANE)
    TB = min(_round_up(tb, SUBLANE), B8,
             max(SUBLANE, _round_up(_cdiv(B8, 4), SUBLANE)))
    while TB > SUBLANE and TB * stream_bytes_per_row > stream_vmem_budget:
        TB = _round_up(TB // 2, SUBLANE)
    n_steps = _cdiv(B8, TB)
    TB = _round_up(_cdiv(B8, n_steps), SUBLANE)     # even blocking, minimal pad
    return TB, n_steps * TB


def mlp_policy_forward(obs, params, eps, *, matmul_dtype=jnp.float32,
                       tb=1024, stream_vmem_budget=24 * 1024 * 1024):
    """Returns (action, log_prob) == MLPPolicy.forward(obs, return_log_prob=True)
    for the continuous branch.  `eps` is the externally supplied N(0,1)
    rsample noise (B, ac_dim) so results are deterministic/checkable.

    matmul_dtype=jnp.bfloat16 streams obs + weights in bf16 (native on every
    TPU MXU; ~halves the dominant HBM read) while accumulation, tanh, exp, eps
    and the log_prob tail remain f32, so log_prob matches the f32 path exactly.
    """
    B, obs_dim = obs.shape
    hidden = params["w1"].shape[1]
    ac_dim = params["w3"].shape[1]

    obs_p = _round_up(obs_dim, LANE)
    h_p = _round_up(hidden, LANE)
    ac_p = _round_up(ac_dim + 1, LANE)     # +1 spare lane carries log_prob
    p_max = max(h_p, ac_p)

    stream_item = jnp.dtype(matmul_dtype).itemsize
    # Double-buffered streamed bytes per batch row: obs in + eps in + fused out.
    stream_bytes_per_row = 2 * (obs_p * stream_item + 2 * ac_p * 4)
    TB, B_p = _pick_batch_tile(B, stream_bytes_per_row, tb=tb,
                               stream_vmem_budget=stream_vmem_budget)

    # Zero padding is exact: padded logstd/eps lanes are 0 (maha/log_det
    # unchanged), padded w/b rows/cols are 0 (padded action lanes stay 0).
    # TODO(synk): for huge, already-aligned inputs these jnp.pad copies are an
    # avoidable extra HBM pass; skip them when B/obs_dim/ac_dim are aligned.
    obs_pad = _pad2d(obs.astype(jnp.float32), B_p, obs_p).astype(matmul_dtype)
    eps_pad = _pad2d(eps.astype(jnp.float32), B_p, ac_p)      # eps stays f32
    w1 = _pad2d(params["w1"], obs_p, h_p).astype(matmul_dtype)
    w2 = _pad2d(params["w2"], h_p, h_p).astype(matmul_dtype)
    w3 = _pad2d(params["w3"], h_p, ac_p).astype(matmul_dtype)

    # Fuse b1/b2/b3/logstd into one (8, p_max) pinned block.
    consts = jnp.zeros((SUBLANE, p_max), jnp.float32)
    consts = consts.at[0, :hidden].set(params["b1"].reshape(-1))
    consts = consts.at[1, :hidden].set(params["b2"].reshape(-1))
    consts = consts.at[2, :ac_dim].set(params["b3"].reshape(-1))
    consts = consts.at[3, :ac_dim].set(params["logstd"].reshape(-1))

    row = lambda i: (i, 0)        # batch-tiled streamed operands
    pinned = lambda i: (0, 0)     # weights/consts stay VMEM-resident across grid

    out_pad = pl.pallas_call(
        functools.partial(mlp_policy_kernel, ac_dim=ac_dim),
        grid=(B_p // TB,),
        in_specs=[
            pl.BlockSpec((TB, obs_p), row),          # obs (matmul_dtype)
            pl.BlockSpec((obs_p, h_p), pinned),      # w1
            pl.BlockSpec((h_p, h_p), pinned),        # w2
            pl.BlockSpec((h_p, ac_p), pinned),       # w3
            pl.BlockSpec((SUBLANE, p_max), pinned),  # b1/b2/b3/logstd fused
            pl.BlockSpec((TB, ac_p), row),           # eps (f32)
        ],
        out_specs=pl.BlockSpec((TB, ac_p), row),     # action + log_prob fused
        out_shape=jax.ShapeDtypeStruct((B_p, ac_p), jnp.float32),
        compiler_params=pltpu.CompilerParams(
            dimension_semantics=("parallel",),       # shard batch across TCs (v7x: 2)
            vmem_limit_bytes=48 * 1024 * 1024,       # headroom under v7x's 64 MiB
        ),
    )(obs_pad, w1, w2, w3, consts, eps_pad)

    # NOTE: if the consumer tolerates the padded layout (or this slice fuses
    # into the consumer's jit), returning out_pad directly saves one more full
    # HBM pass over the kernel output.
    return out_pad[:B, :ac_dim], out_pad[:B, ac_dim]


def init_params(key, obs_dim, hidden, ac_dim):
    k1, k2, k3 = jax.random.split(key, 3)

    def lin(k, fan_in, fan_out):
        bound = 1.0 / math.sqrt(fan_in)
        return jax.random.uniform(k, (fan_in, fan_out), jnp.float32, -bound, bound)

    return {
        "w1": lin(k1, obs_dim, hidden),
        "b1": jnp.zeros((1, hidden), jnp.float32),
        "w2": lin(k2, hidden, hidden),
        "b2": jnp.zeros((1, hidden), jnp.float32),
        "w3": lin(k3, hidden, ac_dim),
        "b3": jnp.zeros((1, ac_dim), jnp.float32),
        # nn.Parameter(torch.zeros(ac_dim)) -> logstd initialized to zeros
        "logstd": jnp.zeros((1, ac_dim), jnp.float32),
    }


if __name__ == "__main__":
    B, OBS, H, AC = 8, 16, 32, 4

    key = jax.random.PRNGKey(0)
    k_obs, k_eps, k_params = jax.random.split(key, 3)

    obs = jax.random.normal(k_obs, (B, OBS), jnp.float32)
    eps = jax.random.normal(k_eps, (B, AC), jnp.float32)   # rsample noise (deterministic)
    params = init_params(k_params, OBS, H, AC)

    # Pure-JAX reference (continuous branch, return_log_prob=True).
    h1 = jnp.tanh(obs @ params["w1"] + params["b1"])
    h2 = jnp.tanh(h1 @ params["w2"] + params["b2"])
    mean = h2 @ params["w3"] + params["b3"]
    std = jnp.exp(params["logstd"])
    ref_action = mean + std * eps
    z = (ref_action - mean) / std
    ref_logp = (-0.5 * jnp.sum(z * z, -1) - jnp.sum(params["logstd"])
                - 0.5 * AC * math.log(2.0 * math.pi))

    # f32 path: strict check.
    action, log_prob = mlp_policy_forward(obs, params, eps)
    jax.block_until_ready((action, log_prob))
    assert jnp.allclose(action, ref_action, atol=1e-5, rtol=1e-5)
    assert jnp.allclose(log_prob, ref_logp, atol=1e-5, rtol=1e-5)

    # bf16 streaming path (production default on v6e/v7x): halves obs/weight
    # HBM traffic, f32 accumulation; log_prob is exact (independent of mean).
    action_bf, logp_bf = mlp_policy_forward(obs, params, eps,
                                            matmul_dtype=jnp.bfloat16)
    jax.block_until_ready((action_bf, logp_bf))
    assert jnp.allclose(action_bf, ref_action, atol=5e-2, rtol=5e-2)
    assert jnp.allclose(logp_bf, ref_logp, atol=1e-4, rtol=1e-5)

    # TODO(synk): discrete (Categorical) branch and the optimizer/update/
    # baseline machinery are training-side PyTorch code, not part of this
    # forward kernel. Optionally generate eps in-kernel (pltpu.prng_seed +
    # pltpu.stateful_normal) when bit-exact external noise is not required.

    print("KERNEL_OK")
</pallas_src>

<mosaic_0001>
module attributes {stable_mosaic.version = 11 : i64} {
  func.func @mlp_policy_kernel(%arg0: i32, %arg1: memref<8x128xf32, #tpu.memory_space<vmem>>, %arg2: memref<128x128xf32, #tpu.memory_space<vmem>>, %arg3: memref<128x128xf32, #tpu.memory_space<vmem>>, %arg4: memref<128x128xf32, #tpu.memory_space<vmem>>, %arg5: memref<8x128xf32, #tpu.memory_space<vmem>>, %arg6: memref<8x128xf32, #tpu.memory_space<vmem>>, %arg7: memref<8x128xf32, #tpu.memory_space<vmem>>) attributes {dimension_semantics = [#tpu.dimension_semantics<parallel>], iteration_bounds = array<i64: 1>, scalar_prefetch = 0 : i64, scratch_operands = 0 : i64, tpu.core_type = #tpu.core_type<tc>, window_params = [{transform_indices = @transform_0, window_bounds = array<i64: 8, 128>}, {pipeline_mode = #tpu.pipeline_mode<synchronous>, transform_indices = @transform_1, window_bounds = array<i64: 128, 128>}, {pipeline_mode = #tpu.pipeline_mode<synchronous>, transform_indices = @transform_2, window_bounds = array<i64: 128, 128>}, {pipeline_mode = #tpu.pipeline_mode<synchronous>, transform_indices = @transform_3, window_bounds = array<i64: 128, 128>}, {pipeline_mode = #tpu.pipeline_mode<synchronous>, transform_indices = @transform_4, window_bounds = array<i64: 8, 128>}, {transform_indices = @transform_5, window_bounds = array<i64: 8, 128>}, {transform_indices = @transform_6, window_bounds = array<i64: 8, 128>}]} {
    %c0 = arith.constant 0 : index
    %c0_0 = arith.constant 0 : index
    %0 = vector.load %arg5[%c0, %c0_0] : memref<8x128xf32, #tpu.memory_space<vmem>>, vector<8x128xf32>
    %1 = vector.extract_strided_slice %0 {offsets = [0, 0], sizes = [1, 128], strides = [1, 1]} : vector<8x128xf32> to vector<1x128xf32>
    %2 = vector.extract_strided_slice %0 {offsets = [1, 0], sizes = [1, 128], strides = [1, 1]} : vector<8x128xf32> to vector<1x128xf32>
    %3 = vector.extract_strided_slice %0 {offsets = [2, 0], sizes = [1, 128], strides = [1, 1]} : vector<8x128xf32> to vector<1x128xf32>
    %4 = vector.extract_strided_slice %0 {offsets = [3, 0], sizes = [1, 128], strides = [1, 1]} : vector<8x128xf32> to vector<1x128xf32>
    %c0_1 = arith.constant 0 : index
    %c0_2 = arith.constant 0 : index
    %5 = vector.load %arg1[%c0_1, %c0_2] : memref<8x128xf32, #tpu.memory_space<vmem>>, vector<8x128xf32>
    %c0_3 = arith.constant 0 : index
    %c0_4 = arith.constant 0 : index
    %6 = vector.load %arg2[%c0_3, %c0_4] : memref<128x128xf32, #tpu.memory_space<vmem>>, vector<128x128xf32>
    %cst = arith.constant dense<0.000000e+00> : vector<8x128xf32>
    %7 = tpu.matmul %5, %6, %cst {dimension_numbers = #tpu.dot_dimension_numbers<[1], [0], [0], [1], [0, 0, 1, 1], [], []>} : vector<8x128xf32>, vector<128x128xf32>, vector<8x128xf32> -> vector<8x128xf32>
    %8 = vector.broadcast %1 : vector<1x128xf32> to vector<8x128xf32>
    %9 = arith.addf %7, %8 : vector<8x128xf32>
    %10 = math.tanh %9 : vector<8x128xf32>
    %c0_5 = arith.constant 0 : index
    %c0_6 = arith.constant 0 : index
    %11 = vector.load %arg3[%c0_5, %c0_6] : memref<128x128xf32, #tpu.memory_space<vmem>>, vector<128x128xf32>
    %cst_7 = arith.constant dense<0.000000e+00> : vector<8x128xf32>
    %12 = tpu.matmul %10, %11, %cst_7 {dimension_numbers = #tpu.dot_dimension_numbers<[1], [0], [0], [1], [0, 0, 1, 1], [], []>} : vector<8x128xf32>, vector<128x128xf32>, vector<8x128xf32> -> vector<8x128xf32>
    %13 = vector.broadcast %2 : vector<1x128xf32> to vector<8x128xf32>
    %14 = arith.addf %12, %13 : vector<8x128xf32>
    %15 = math.tanh %14 : vector<8x128xf32>
    %c0_8 = arith.constant 0 : index
    %c0_9 = arith.constant 0 : index
    %16 = vector.load %arg4[%c0_8, %c0_9] : memref<128x128xf32, #tpu.memory_space<vmem>>, vector<128x128xf32>
    %cst_10 = arith.constant dense<0.000000e+00> : vector<8x128xf32>
    %17 = tpu.matmul %15, %16, %cst_10 {dimension_numbers = #tpu.dot_dimension_numbers<[1], [0], [0], [1], [0, 0, 1, 1], [], []>} : vector<8x128xf32>, vector<128x128xf32>, vector<8x128xf32> -> vector<8x128xf32>
    %18 = vector.broadcast %3 : vector<1x128xf32> to vector<8x128xf32>
    %19 = arith.addf %17, %18 : vector<8x128xf32>
    %20 = math.exp %4 : vector<1x128xf32>
    %c0_11 = arith.constant 0 : index
    %c0_12 = arith.constant 0 : index
    %21 = vector.load %arg6[%c0_11, %c0_12] : memref<8x128xf32, #tpu.memory_space<vmem>>, vector<8x128xf32>
    %22 = vector.broadcast %20 : vector<1x128xf32> to vector<8x128xf32>
    %23 = arith.mulf %22, %21 : vector<8x128xf32>
    %24 = arith.addf %19, %23 : vector<8x128xf32>
    %25 = arith.mulf %21, %21 : vector<8x128xf32>
    %cst_13 = arith.constant dense<0.000000e+00> : vector<8xf32>
    %26 = vector.multi_reduction <add>, %25, %cst_13 [1] : vector<8x128xf32> to vector<8xf32>
    %27 = vector.shape_cast %26 : vector<8xf32> to vector<8x1xf32>
    %cst_14 = arith.constant dense<0.000000e+00> : vector<1xf32>
    %28 = vector.multi_reduction <add>, %4, %cst_14 [1] : vector<1x128xf32> to vector<1xf32>
    %29 = vector.shape_cast %28 : vector<1xf32> to vector<1x1xf32>
    %cst_15 = arith.constant -5.000000e-01 : f32
    %30 = vector.broadcast %cst_15 : f32 to vector<8x1xf32>
    %31 = arith.mulf %30, %27 : vector<8x1xf32>
    %32 = vector.broadcast %29 : vector<1x1xf32> to vector<8x1xf32>
    %33 = arith.subf %31, %32 : vector<8x1xf32>
    %cst_16 = arith.constant 3.67575407 : f32
    %34 = vector.broadcast %cst_16 : f32 to vector<8x1xf32>
    %35 = arith.subf %33, %34 : vector<8x1xf32>
    %36 = tpu.iota {dimensions = array<i32: 1>} : vector<8x128xi32>
    %c4_i32 = arith.constant 4 : i32
    %37 = vector.broadcast %c4_i32 : i32 to vector<8x128xi32>
    %38 = arith.cmpi eq, %36, %37 : vector<8x128xi32>
    %39 = vector.shape_cast %35 : vector<8x1xf32> to vector<8x1xf32>
    %40 = vector.broadcast %39 : vector<8x1xf32> to vector<8x128xf32>
    %41 = arith.select %38, %40, %24 : vector<8x128xi1>, vector<8x128xf32>
    %c0_17 = arith.constant 0 : index
    %c0_18 = arith.constant 0 : index
    %42 = vector.load %arg7[%c0_17, %c0_18] : memref<8x128xf32, #tpu.memory_space<vmem>>, vector<8x128xf32>
    tpu.vector_store %arg7[%c0_17, %c0_18], %41 {strides = array<i32>} : memref<8x128xf32, #tpu.memory_space<vmem>>, vector<8x128xf32>,
    return
  }
  func.func @transform_0(%arg0: i32) -> (i32, i32) {
    %c0_i32 = arith.constant 0 : i32
    %c0_i32_0 = arith.constant 0 : i32
    return %arg0, %c0_i32 : i32, i32
  }
  func.func @transform_1(%arg0: i32) -> (i32, i32) {
    %c0_i32 = arith.constant 0 : i32
    %c0_i32_0 = arith.constant 0 : i32
    %c0_i32_1 = arith.constant 0 : i32
    return %c0_i32, %c0_i32_0 : i32, i32
  }
  func.func @transform_2(%arg0: i32) -> (i32, i32) {
    %c0_i32 = arith.constant 0 : i32
    %c0_i32_0 = arith.constant 0 : i32
    %c0_i32_1 = arith.constant 0 : i32
    return %c0_i32, %c0_i32_0 : i32, i32
  }
  func.func @transform_3(%arg0: i32) -> (i32, i32) {
    %c0_i32 = arith.constant 0 : i32
    %c0_i32_0 = arith.constant 0 : i32
    %c0_i32_1 = arith.constant 0 : i32
    return %c0_i32, %c0_i32_0 : i32, i32
  }
  func.func @transform_4(%arg0: i32) -> (i32, i32) {
    %c0_i32 = arith.constant 0 : i32
    %c0_i32_0 = arith.constant 0 : i32
    %c0_i32_1 = arith.constant 0 : i32
    return %c0_i32, %c0_i32_0 : i32, i32
  }
  func.func @transform_5(%arg0: i32) -> (i32, i32) {
    %c0_i32 = arith.constant 0 : i32
    %c0_i32_0 = arith.constant 0 : i32
    return %arg0, %c0_i32 : i32, i32
  }
  func.func @transform_6(%arg0: i32) -> (i32, i32) {
    %c0_i32 = arith.constant 0 : i32
    %c0_i32_0 = arith.constant 0 : i32
    return %arg0, %c0_i32 : i32, i32
  }
}

</mosaic_0001>

<bundles_post_ra>
// kernel: tpu_custom_call.1
= control target key start
LH: loop header
LB: loop body
LE: loop exit
PB: predicated region body
PF: predicated region fallthrough
CT: control target
= control target key end

     0   :  { %11 = vsyncpa [#allocation3], 0  ;;  %s909_s0 = inlined_call_operand.hbm [shape: f32[8,128], index: 0, kind: input, shape index: {}]   ;;  %s910_s1 = inlined_call_operand.hbm [shape: f32[128,128], index: 1, kind: input, shape index: {}]   ;;  %s911_s2 = inlined_call_operand.hbm [shape: f32[128,128], index: 2, kind: input, shape index: {}]   ;;  %s912_s3 = inlined_call_operand.hbm [shape: f32[128,128], index: 3, kind: input, shape index: {}]   ;;  %s913_s4 = inlined_call_operand.vmem [shape: f32[8,128], index: 4, kind: input, shape index: {}]   ;;  %s914_s5 = inlined_call_operand.vmem [shape: f32[8,128], index: 5, kind: input, shape index: {}]   ;;  %s915_s6 = inlined_call_operand.hbm [shape: f32[8,128], index: 6, kind: output, shape index: {}]  }
   0x1   :  { %12 = vsyncpa [#allocation6], 0 }
   0x2   :  { %13 = vsyncpa [#allocation9], 0 }
   0x3   :  { %14 = vsyncpa [#allocation4], 0  ;;  %s759_s21 = smov [#allocation5]   ;;  %s641_s25 = scalar_lea.hbm %s910_s1, 2048 }
   0x4   :  { %s30_s22 = sshll.u32 %s759_s21, 4  ;;  %p642_p0 = scmp.ne.s32.totalorder %s910_s1, %s641_s25  ;;  %s31_s22 = int_to_ptr.vmem [resolvable:$true] %s30_s22 }
   0x5   :  { %p645_p1 = scmp.lt.u32.totalorder %s641_s25, %s910_s1 }
   0x7   :  { %p647_p2 = pnand %p645_p1, %p642_p0 }
   0x9   :  { %650 = shalt.err (!%p647_p2)
}
   0xa   :  { %s651_s30 = scalar_lea.vmem %s31_s22, 2048  ;;  %p656_p4 = scmp.lt.s32.totalorder %s31_s22, %s31_s22 }
   0xb   :  { %p652_p3 = scmp.ne.s32.totalorder %s31_s22, %s651_s30  ;;  %p657_p5 = scmp.lt.s32.totalorder %s651_s30, %s651_s30 }
   0xd   :  { %p658_p6 = por %p657_p5, %p656_p4 }
   0xf   :  { %p659_p7 = pnand %p658_p6, %p652_p3 }
  0x11   :  { %662 = shalt.err (!%p659_p7)
}
  0x12   :  { %s760_s7 = smov 128   ;;  %s761_s8 = smov 8  }
  0x13   :  { %36 = dma.hbm_to_vmem [thread:$0]  %s910_s1, 2048, %s31_s22, [#allocation6], %s760_s7, %s760_s7, %s761_s8  }
  0x14   :  { %s762_s11 = smov [#allocation2]   ;;  %s763_s13 = smov [#allocation7]  }
  0x15   :  { %s21_s12 = sshll.u32 %s762_s11, 4  ;;  %s42_s14 = sshll.u32 %s763_s13, 4  ;;  %s22_s12 = int_to_ptr.vmem [resolvable:$true] %s21_s12  ;;  %s43_s14 = int_to_ptr.vmem [resolvable:$true] %s42_s14 }
  0x16   :  { %s663_s17 = scalar_lea.hbm %s909_s0, 128 }
  0x17   :  { %p664_p8 = scmp.ne.s32.totalorder %s909_s0, %s663_s17  ;;  %p667_p9 = scmp.lt.u32.totalorder %s663_s17, %s909_s0 }
  0x19   :  { %p669_p10 = pnand %p667_p9, %p664_p8 }
  0x1b   :  { %672 = shalt.err (!%p669_p10)
}
  0x1c   :  { %s673_s1 = scalar_lea.vmem %s22_s12, 128  ;;  %p678_p12 = scmp.lt.s32.totalorder %s22_s12, %s22_s12 }
  0x1d   :  { %p674_p11 = scmp.ne.s32.totalorder %s22_s12, %s673_s1  ;;  %p679_p13 = scmp.lt.s32.totalorder %s673_s1, %s673_s1 }
  0x1f   :  { %p680_p0 = por %p679_p13, %p678_p12 }
  0x21   :  { %p681_p1 = pnand %p680_p0, %p674_p11 }
  0x23   :  { %684 = shalt.err (!%p681_p1)
}
  0x24   :  { %24 = dma.hbm_to_vmem [thread:$0]  %s909_s0, 128, %s22_s12, [#allocation3]  }
  0x25   :  { %s685_s26 = scalar_lea.hbm %s911_s2, 2048 }
  0x26   :  { %p686_p2 = scmp.ne.s32.totalorder %s911_s2, %s685_s26  ;;  %p689_p3 = scmp.lt.u32.totalorder %s685_s26, %s911_s2 }
  0x28   :  { %p691_p4 = pnand %p689_p3, %p686_p2 }
  0x2a   :  { %694 = shalt.err (!%p691_p4)
}
  0x2b   :  { %s695_s9 = scalar_lea.vmem %s43_s14, 2048  ;;  %p700_p6 = scmp.lt.s32.totalorder %s43_s14, %s43_s14 }
  0x2c   :  { %p696_p5 = scmp.ne.s32.totalorder %s43_s14, %s695_s9  ;;  %p701_p7 = scmp.lt.s32.totalorder %s695_s9, %s695_s9 }
  0x2e   :  { %p702_p8 = por %p701_p7, %p700_p6 }
  0x30   :  { %p703_p9 = pnand %p702_p8, %p696_p5 }
  0x32   :  { %706 = shalt.err (!%p703_p9)
}
  0x33   :  { %48 = dma.hbm_to_vmem [thread:$0]  %s911_s2, 2048, %s43_s14, [#allocation6], %s760_s7, %s760_s7, %s761_s8  }
  0x34   :  { %s764_s11 = smov [#allocation8]   ;;  %s707_s16 = scalar_lea.hbm %s912_s3, 2048 }
  0x35   :  { %s54_s12 = sshll.u32 %s764_s11, 4  ;;  %p708_p10 = scmp.ne.s32.totalorder %s912_s3, %s707_s16  ;;  %s55_s12 = int_to_ptr.vmem [resolvable:$true] %s54_s12 }
  0x36   :  { %p711_p11 = scmp.lt.u32.totalorder %s707_s16, %s912_s3 }
  0x38   :  { %p713_p12 = pnand %p711_p11, %p708_p10 }
  0x3a   :  { %716 = shalt.err (!%p713_p12)
}
  0x3b   :  { %s717_s21 = scalar_lea.vmem %s55_s12, 2048  ;;  %p722_p0 = scmp.lt.s32.totalorder %s55_s12, %s55_s12 }
  0x3c   :  { %p718_p13 = scmp.ne.s32.totalorder %s55_s12, %s717_s21  ;;  %p723_p1 = scmp.lt.s32.totalorder %s717_s21, %s717_s21 }
  0x3e   :  { %p724_p2 = por %p723_p1, %p722_p0 }
  0x40   :  { %p725_p3 = pnand %p724_p2, %p718_p13 }
  0x42   :  { %728 = shalt.err (!%p725_p3)
}
  0x43   :  { %60 = dma.hbm_to_vmem [thread:$0]  %s912_s3, 2048, %s55_s12, [#allocation9], %s760_s7, %s760_s7, %s761_s8  }
  0x44   :  { %751 = dma.done.wait [#allocation3], 128  }
  0x45   :  { %752 = vsyncadd [#allocation3], 4294967168 }
  0x46   :  { %753 = dma.done.wait [#allocation6], 4096  }
  0x47   :  { %754 = vsyncadd [#allocation6], 4294963200 }
  0x48   :  { %755 = dma.done.wait [#allocation9], 2048  }
  0x49   :  { %756 = vsyncadd [#allocation9], 4294965248  ;;  %v765_v0 = vmov 0.0|0.0   ;;  %vm766_vm0 = vmmov 0   ;;  %v767_v1 = vmov 0.0   ;;  %v79_v2 = vld [vmem:[#allocation5] sm:$0xff] }
  0x4a   :  { %553 = vmatprep.subr.bf16.mxu0 %v765_v0  ;;  %480 = vmatprep.mubr.msk.f32.mxu0 %vm766_vm0, %v767_v1  ;;  %v80_v3 = vld [vmem:[#allocation5 + $0x8] sm:$0xff]  ;;  %v81_v4 = vld [vmem:[#allocation5 + $0x10] sm:$0xff]  ;;  %v82_v6 = vld [vmem:[#allocation5 + $0x18] sm:$0xff]  ;;  %vm363_vm1 = vcmask 1043459  }
  0x4b   :  { %577 = vmatprep.subr.bf16.mxu1 %v765_v0  ;;  %515 = vmatprep.mubr.msk.f32.mxu1 %vm766_vm0, %v767_v1  ;;  %v554_v5 = vpack.c.bf16 %v80_v3, %v79_v2  ;;  %v557_v7 = vpack.c.bf16 %v82_v6, %v81_v4  ;;  %v83_v8 = vld [vmem:[#allocation5 + $0x20] sm:$0xff]  ;;  %v84_v9 = vld [vmem:[#allocation5 + $0x28] sm:$0xff]  ;;  %v172_v12 = vld [vmem:[#allocation7 + $0x10] sm:$0xff]  ;;  %v95_v3 = vlaneseq }
  0x4c   :  { %v170_v10 = vld [vmem:[#allocation7] sm:$0xff]  ;;  %v171_v11 = vld [vmem:[#allocation7 + $0x8] sm:$0xff]  ;;  %v173_v13 = vld [vmem:[#allocation7 + $0x18] sm:$0xff]  ;;  %v560_v14 = vpack.c.bf16 %v84_v9, %v83_v8 }
  0x4d   :  { %555 = vmatpush3.bf16.msra.mxu0 %v554_v5  ;;  %v578_v15 = vpack.c.bf16 %v171_v11, %v170_v10  ;;  %v85_v16 = vld [vmem:[#allocation5 + $0x30] sm:$0xff]  ;;  %v86_v17 = vld [vmem:[#allocation5 + $0x38] sm:$0xff]  ;;  %v581_v18 = vpack.c.bf16 %v173_v13, %v172_v12  ;;  %v174_v19 = vld [vmem:[#allocation7 + $0x20] sm:$0xff]  ;;  %v96_v4 = vshrl.u32 %v95_v3, 7 }
  0x4e   :  { %556 = vmatprep.subr.bf16.mxu0 %v765_v0  ;;  %v175_v20 = vld [vmem:[#allocation7 + $0x28] sm:$0xff]  ;;  %v563_v21 = vpack.c.bf16 %v86_v17, %v85_v16  ;;  %v87_v22 = vld [vmem:[#allocation5 + $0x40] sm:$0xff]  ;;  %v176_v25 = vld [vmem:[#allocation7 + $0x30] sm:$0xff] }
  0x4f   :  { %579 = vmatpush3.bf16.msra.mxu1 %v578_v15  ;;  %v88_v23 = vld [vmem:[#allocation5 + $0x48] sm:$0xff]  ;;  %v584_v24 = vpack.c.bf16 %v175_v20, %v174_v19  ;;  %v177_v26 = vld [vmem:[#allocation7 + $0x38] sm:$0xff]  ;;  %v89_v28 = vld [vmem:[#allocation5 + $0x50] sm:$0xff]  ;;  %v97_v5 = vsub.s32 0, %v96_v4 }
  0x50   :  { %580 = vmatprep.subr.bf16.mxu1 %v765_v0  ;;  %v566_v27 = vpack.c.bf16 %v88_v23, %v87_v22  ;;  %v90_v29 = vld [vmem:[#allocation5 + $0x58] sm:$0xff]  ;;  %v587_v30 = vpack.c.bf16 %v177_v26, %v176_v25  ;;  %v178_v31 = vld [vmem:[#allocation7 + $0x40] sm:$0xff]  ;;  %v179_v32 = vld [vmem:[#allocation7 + $0x48] sm:$0xff] }
  0x51   :  { %558 = vmatpush3.bf16.msra.mxu0 %v557_v7  ;;  %v569_v33 = vpack.c.bf16 %v90_v29, %v89_v28  ;;  %v91_v34 = vld [vmem:[#allocation5 + $0x60] sm:$0xff]  ;;  %v92_v35 = vld [vmem:[#allocation5 + $0x68] sm:$0xff]  ;;  %v590_v36 = vpack.c.bf16 %v179_v32, %v178_v31  ;;  %v93_v38 = vld [vmem:[#allocation5 + $0x70] sm:$0xff]  ;;  %v356_v31 = vsub.s32 3, %v96_v4 }
  0x52   :  { %559 = vmatprep.subr.bf16.mxu0 %v765_v0  ;;  %v572_v37 = vpack.c.bf16 %v92_v35, %v91_v34  ;;  %v94_v39 = vld [vmem:[#allocation5 + $0x78] sm:$0xff]  ;;  %v180_v42 = vld [vmem:[#allocation7 + $0x50] sm:$0xff]  ;;  %v182_v45 = vld [vmem:[#allocation7 + $0x60] sm:$0xff]  ;;  %v279_v34 = vsub.s32 2, %v96_v4 }
  0x53   :  { %582 = vmatpush3.bf16.msra.mxu1 %v581_v18  ;;  %v575_v40 = vpack.c.bf16 %v94_v39, %v93_v38  ;;  %v78_v41 = vld [vmem:[#allocation2] sm:$0xff]  ;;  %v183_v46 = vld [vmem:[#allocation7 + $0x68] sm:$0xff]  ;;  %v184_v48 = vld [vmem:[#allocation7 + $0x70] sm:$0xff]  ;;  %v375_v39 = vand.u32 127, %v95_v3 }
  0x54   :  { %583 = vmatprep.subr.bf16.mxu1 %v765_v0  ;;  %v181_v43 = vld [vmem:[#allocation7 + $0x58] sm:$0xff]  ;;  %v596_v47 = vpack.c.bf16 %v183_v46, %v182_v45  ;;  %v261_v51 = vld [vmem:[#allocation8] sm:$0xff]  ;;  %v262_v52 = vld [vmem:[#allocation8 + $0x8] sm:$0xff] }
  0x55   :  { %561 = vmatpush3.bf16.msra.mxu0 %v560_v14  ;;  %v593_v44 = vpack.c.bf16 %v181_v43, %v180_v42  ;;  %v185_v49 = vld [vmem:[#allocation7 + $0x78] sm:$0xff]  ;;  %v263_v53 = vld [vmem:[#allocation8 + $0x10] sm:$0xff]  ;;  %v602_v54 = vpack.c.bf16 %v262_v52, %v261_v51  ;;  %v265_v57 = vld [vmem:[#allocation8 + $0x20] sm:$0xff]  ;;  %vm376_vm2 = vcmp.eq.s32.totalorder %v375_v39, 4 }
  0x56   :  { %562 = vmatprep.subr.bf16.mxu0 %v765_v0  ;;  %v599_v50 = vpack.c.bf16 %v185_v49, %v184_v48  ;;  %v264_v55 = vld [vmem:[#allocation8 + $0x18] sm:$0xff]  ;;  %v266_v58 = vld [vmem:[#allocation8 + $0x28] sm:$0xff]  ;;  %v267_v60 = vld [vmem:[#allocation8 + $0x30] sm:$0xff] }
  0x57   :  { %585 = vmatpush3.bf16.msra.mxu1 %v584_v24  ;;  %v605_v56 = vpack.c.bf16 %v264_v55, %v263_v53  ;;  %v608_v59 = vpack.c.bf16 %v266_v58, %v265_v57  ;;  %v268_v61 = vld [vmem:[#allocation8 + $0x38] sm:$0xff]  ;;  %v269_v63 = vld [vmem:[#allocation8 + $0x40] sm:$0xff]  ;;  %v271_v12 = vld [vmem:[#allocation8 + $0x50] sm:$0xff]  ;;  %v188_v24 = vsub.s32 1, %v96_v4 }
  0x58   :  { %586 = vmatprep.subr.bf16.mxu1 %v765_v0  ;;  %v611_v62 = vpack.c.bf16 %v268_v61, %v267_v60  ;;  %v77_v6 = vld [vmem:[%s913_s4] sm:$0xff]  ;;  %v273_v15 = vld [vmem:[#allocation8 + $0x60] sm:$0xff]  ;;  %v274_v16 = vld [vmem:[#allocation8 + $0x68] sm:$0xff] }
  0x59   :  { %564 = vmatpush3.bf16.msra.mxu0 %v563_v21  ;;  %v98_v7 = vrot.slane %v77_v6, %v97_v5  ;;  %v272_v13 = vld [vmem:[#allocation8 + $0x58] sm:$0xff]  ;;  %v620_v17 = vpack.c.bf16 %v274_v16, %v273_v15  ;;  %v275_v18 = vld [vmem:[#allocation8 + $0x70] sm:$0xff]  ;;  %v364_v23 = vsel %vm363_vm1, %v77_v6, 0.0  ;;  %v189_v25 = vrot.slane %v77_v6, %v188_v24 }
  0x5a   :  { %565 = vmatprep.subr.bf16.mxu0 %v765_v0  ;;  %v617_v14 = vpack.c.bf16 %v272_v13, %v271_v12  ;;  %v276_v19 = vld [vmem:[#allocation8 + $0x78] sm:$0xff]  ;;  %v280_v38 = vrot.slane %v77_v6, %v279_v34 }
  0x5b   :  { %588 = vmatpush3.bf16.msra.mxu1 %v587_v30  ;;  %v623_v20 = vpack.c.bf16 %v276_v19, %v275_v18  ;;  %v353_v21 = vld [vmem:[%s914_s5] sm:$0xff]  ;;  %v351_v30 = vmul.f32 1.442695, %v77_v6  ;;  %s768_s5 = smov [#allocation10]  }
  0x5c   :  { %589 = vmatprep.subr.bf16.mxu1 %v765_v0  ;;  %v360_v22 = vmul.f32 %v353_v21, %v353_v21  ;;  %s385_s1 = sshll.u32 %s768_s5, 4  ;;  %s386_s1 = int_to_ptr.vmem [resolvable:$true] %s385_s1 }
  0x5d   :  { %567 = vmatpush3.bf16.msra.mxu0 %v566_v27  ;;  %s729_s22 = scalar_lea.vmem %s386_s1, 128  ;;  %p734_p5 = scmp.lt.s32.totalorder %s386_s1, %s386_s1 }
  0x5e   :  { %568 = vmatprep.subr.bf16.mxu0 %v765_v0  ;;  %361 = vadd.xlane.f32.xlu0 %v360_v22  ;;  %p730_p4 = scmp.ne.s32.totalorder %s386_s1, %s729_s22  ;;  %p735_p6 = scmp.lt.s32.totalorder %s729_s22, %s729_s22 }
  0x5f   :  { %591 = vmatpush3.bf16.msra.mxu1 %v590_v36 }
  0x60   :  { %592 = vmatprep.subr.bf16.mxu1 %v765_v0  ;;  %p736_p7 = por %p735_p6, %p734_p5 }
  0x61   :  { %570 = vmatpush3.bf16.msra.mxu0 %v569_v33 }
  0x62   :  { %571 = vmatprep.subr.bf16.mxu0 %v765_v0  ;;  %365 = vadd.xlane.f32.xlu0 %v364_v23  ;;  %p737_p8 = pnand %p736_p7, %p730_p4 }
  0x63   :  { %594 = vmatpush3.bf16.msra.mxu1 %v593_v44 }
  0x64   :  { %595 = vmatprep.subr.bf16.mxu1 %v765_v0 }
  0x65   :  { %573 = vmatpush3.bf16.msra.mxu0 %v572_v37 }
  0x66   :  { %574 = vmatprep.subr.bf16.mxu0 %v765_v0 }
  0x67   :  { %597 = vmatpush3.bf16.msra.mxu1 %v596_v47 }
  0x68   :  { %598 = vmatprep.subr.bf16.mxu1 %v765_v0 }
  0x69   :  { %576 = vmatpush3.bf16.msra.mxu0 %v575_v40 }
  0x6a   :  { %601 = vmatprep.subr.bf16.mxu0 %v765_v0 }
  0x6b   :  { %600 = vmatpush3.bf16.msra.mxu1 %v599_v50 }
  0x6c   :  { %481 = vmatmul.mubr.f32.vlgmr.msra.gmra.mrb[0].mxu0 %v78_v41 }
  0x6d   :  { %550 = vmatprep.mubr.msk.f32.mxu0 %vm766_vm0, %v767_v1  ;;  %603 = vmatpush3.bf16.msra.mxu0 %v602_v54  ;;  %v270_v1 = vld [vmem:[#allocation8 + $0x48] sm:$0xff] }
  0x6e   :  { %604 = vmatprep.subr.bf16.mxu0 %v765_v0  ;;  %v614_v2 = vpack.c.bf16 %v270_v1, %v269_v63 }
  0x71   :  { %606 = vmatpush3.bf16.msra.mxu0 %v605_v56 }
  0x72   :  { %607 = vmatprep.subr.bf16.mxu0 %v765_v0 }
  0x75   :  { %609 = vmatpush3.bf16.msra.mxu0 %v608_v59 }
  0x76   :  { %610 = vmatprep.subr.bf16.mxu0 %v765_v0 }
  0x79   :  { %612 = vmatpush3.bf16.msra.mxu0 %v611_v62 }
  0x7a   :  { %613 = vmatprep.subr.bf16.mxu0 %v765_v0 }
  0x7d   :  { %615 = vmatpush3.bf16.msra.mxu0 %v614_v2 }
  0x7e   :  { %616 = vmatprep.subr.bf16.mxu0 %v765_v0 }
  0x81   :  { %618 = vmatpush3.bf16.msra.mxu0 %v617_v14 }
  0x82   :  { %619 = vmatprep.subr.bf16.mxu0 %v765_v0 }
  0x85   :  { %621 = vmatpush3.bf16.msra.mxu0 %v620_v17 }
  0x86   :  { %622 = vmatprep.subr.bf16.mxu0 %v765_v0 }
  0x89   :  { %624 = vmatpush3.bf16.msra.mxu0 %v623_v20 }
  0xeb   :  { %v362_v0 = vpop.xlane.xlu0 %361 }
  0xec   :  { %v367_v36 = vmul.f32 -0.5, %v362_v0 }
  0xef   :  { %v366_v33 = vpop.xlane.xlu0 %365 }
  0xf0   :  { %v371_v37 = vrot.slane %v366_v33, %v356_v31 }
  0xf2   :  { %v372_v41 = vsub.f32 %v367_v36, %v371_v37 }
  0xf4   :  { %v396_v45 = vadd.f32 -3.675754, %v372_v41 }
 0x13f   :  { %v165_v8 = vpop.f32.mrb[0].mxu0 }
 0x140   :  { %v166_v9 = vadd.f32 %v165_v8, %v98_v7  ;;  %v482_v10 = vpop.f32.mrb[1].mxu0 }
 0x142   :  { %635 = vtanh.f32 %v166_v9 }
 0x14c   :  { %v636_v11 = vpop.eup %635 }
 0x14d   :  { %516 = vmatmul.mubr.f32.vlgmr.msra.gmra.mrb[0].mxu1 %v636_v11 }
 0x220   :  { %v256_v26 = vpop.f32.mrb[0].mxu1 }
 0x221   :  { %v257_v27 = vadd.f32 %v256_v26, %v189_v25  ;;  %v517_v28 = vpop.f32.mrb[1].mxu1 }
 0x223   :  { %637 = vtanh.f32 %v257_v27 }
 0x224   :  { %639 = vpow2.f32 %v351_v30 }
 0x22d   :  { %v638_v29 = vpop.eup %637 }
 0x22e   :  { %551 = vmatmul.mubr.f32.vlgmr.msra.gmra.mrb[2].mxu0 %v638_v29  ;;  %v640_v32 = vpop.eup %639 }
 0x22f   :  { %v357_v35 = vrot.slane %v640_v32, %v356_v31 }
 0x231   :  { %v358_v40 = vmul.f32 %v357_v35, %v353_v21 }
 0x301   :  { %v347_v42 = vpop.f32.mrb[2].mxu0 }
 0x302   :  { %v348_v43 = vadd.f32 %v347_v42, %v280_v38  ;;  %v552_v44 = vpop.f32.mrb[3].mxu0 }
 0x304   :  { %v359_v46 = vadd.f32 %v358_v40, %v348_v43 }
 0x306   :  { %v377_v47 = vsel %vm376_vm2, %v396_v45, %v359_v46 }
 0x307   :  { %378 = vst [vmem:[#allocation10] sm:$0xff] %v377_v47 }
 0x308   :  { %740 = shalt.err (!%p737_p8)
}
 0x309   :  { %s741_s25 = scalar_lea.hbm %s915_s6, 128 }
 0x30a   :  { %p742_p9 = scmp.ne.s32.totalorder %s915_s6, %s741_s25  ;;  %p745_p10 = scmp.lt.u32.totalorder %s741_s25, %s915_s6 }
 0x30c   :  { %p747_p11 = pnand %p745_p10, %p742_p9 }
 0x30e   :  { %750 = shalt.err (!%p747_p11)
}
 0x30f   :  { %388 = dma.vmem_to_hbm [thread:$0]  %s386_s1, 128, %s915_s6, [#allocation4]  }
 0x310   :  { %757 = dma.done.wait [#allocation4], 128  }
 0x311   :  { %758 = vsyncadd [#allocation4], 4294967168 }
 0x312   :  { %392 = vsyncpa [#allocation3], 1 }
 0x313   :  { %393 = vsyncpa [#allocation6], 1 }
 0x314   :  { %394 = vsyncpa [#allocation9], 1 }
 0x315   :  { %395 = vsyncpa [#allocation4], 1 }

</bundles_post_ra>
